<compile_context>
chip_gen: v7x
topology: tpu7x:2x2x1
jax: 0.10.0
libtpu: 0.0.40
codegen_flags: <defaults>
</compile_context>

<pallas_src>
import functools

import jax
import jax.numpy as jnp
from jax import lax
from jax.experimental import pallas as pl
from jax.experimental.pallas import tpu as pltpu

# Explicit scoped-VMEM budget: above the v5e(16)/v6e-v7x(32) MiB defaults,
# comfortably below v7x's 64 MiB physical VMEM.
_VMEM_LIMIT = 48 * 1024 * 1024


# ----------------------------------------------------------------------------
# Tiling helpers
# ----------------------------------------------------------------------------
def _tile(dim, preferred):
    """Largest preferred tile that evenly divides `dim`, else the full dim."""
    for p in preferred:
        if p <= dim and dim % p == 0:
            return p
    return dim


def _row_tile(m, preferred=(512, 256, 1024, 128, 64, 32, 16, 8)):
    """Row tile that keeps >=2 row blocks (megacore-shardable 'parallel' axis
    on v7x) while staying large enough that weight refetch is at most ~2x."""
    for t in preferred:
        if t <= m and m % t == 0 and m // t >= 2:
            return t
    return _tile(m, preferred)


def _heads_per_group(num_heads, head_dim):
    """Largest divisor g of num_heads with g*head_dim <= 256: one full-width
    MXU contraction pass for the fused output projection and lane-dense
    context stores, while bounding per-grid-step attention live ranges."""
    best = 1
    for g in range(1, num_heads + 1):
        if num_heads % g == 0 and g * head_dim <= 256:
            best = g
    return best


# ----------------------------------------------------------------------------
# Kernel A: tiled matmul + bias (+ optional GELU), grouped-column output
# ----------------------------------------------------------------------------
def _matmul_bias_kernel(x_ref, w_ref, b_ref, o_ref, acc_ref, *, activation, nk):
    @pl.when(pl.program_id(2) == 0)
    def _():
        acc_ref[...] = jnp.zeros_like(acc_ref)

    # bf16 operands into the MXU, f32 accumulation.
    acc_ref[...] += jnp.dot(x_ref[...].astype(jnp.bfloat16), w_ref[0],
                            preferred_element_type=jnp.float32)

    @pl.when(pl.program_id(2) == nk - 1)
    def _():
        y = acc_ref[...] + b_ref[0]
        if activation == "gelu":
            # TODO(synk): HF BERT/SpanBERT uses exact erf GELU; tanh approx is
            # kept (EUP-friendly, previously verified Mosaic lowering).
            y = jax.nn.gelu(y, approximate=True)
        o_ref[0, :, :] = y.astype(o_ref.dtype)


def matmul_bias_grouped(x, w, b, activation=None, out_dtype=jnp.bfloat16):
    """[M,K] @ grouped-weight [nJ,K,J] + [nJ,1,J] -> [nJ,M,J] (optional GELU).

    The output is emitted directly in the column-grouped layout consumed by
    the attention / grouped-contraction kernels (no host reshape/transpose).
    """
    M, K = x.shape
    nJ, _, J = w.shape
    tm = _tile(M, (1024, 512, 256, 128, 64, 32, 16, 8))
    tk = _tile(K, (1024, 768, 512, 256, 128))
    nm, nk = M // tm, K // tk
    kern = functools.partial(_matmul_bias_kernel, activation=activation, nk=nk)
    cost = pl.CostEstimate(
        flops=2 * M * K * nJ * J,
        transcendentals=M * nJ * J if activation == "gelu" else 0,
        bytes_accessed=4 * M * K + 2 * K * nJ * J + 2 * M * nJ * J)
    return pl.pallas_call(
        kern,
        out_shape=jax.ShapeDtypeStruct((nJ, M, J), out_dtype),
        grid=(nm, nJ, nk),
        in_specs=[
            pl.BlockSpec((tm, tk), lambda i, j, k: (i, k)),
            pl.BlockSpec((1, tk, J), lambda i, j, k: (j, k, 0)),
            pl.BlockSpec((1, 1, J), lambda i, j, k: (j, 0, 0)),
        ],
        out_specs=pl.BlockSpec((1, tm, J), lambda i, j, k: (j, i, 0)),
        scratch_shapes=[pltpu.VMEM((tm, J), jnp.float32)],
        compiler_params=pltpu.CompilerParams(
            dimension_semantics=("parallel", "parallel", "arbitrary"),
            vmem_limit_bytes=_VMEM_LIMIT),
        cost_estimate=cost,
    )(x, w, b)


# ----------------------------------------------------------------------------
# Kernel B: grouped-contraction matmul + bias + residual + LayerNorm (+ mask)
# ----------------------------------------------------------------------------
def _matmul_res_ln_kernel(*refs, nk, eps, apply_mask):
    if apply_mask:
        x_ref, w_ref, b_ref, res_ref, g_ref, bt_ref, m_ref, o_ref, acc_ref = refs
    else:
        x_ref, w_ref, b_ref, res_ref, g_ref, bt_ref, o_ref, acc_ref = refs
        m_ref = None

    @pl.when(pl.program_id(1) == 0)
    def _():
        acc_ref[...] = jnp.zeros_like(acc_ref)

    acc_ref[...] += jnp.dot(x_ref[0].astype(jnp.bfloat16), w_ref[0],
                            preferred_element_type=jnp.float32)

    @pl.when(pl.program_id(1) == nk - 1)
    def _():
        z = acc_ref[...] + b_ref[...] + res_ref[...]
        mu = jnp.mean(z, axis=-1, keepdims=True)
        var = jnp.mean((z - mu) * (z - mu), axis=-1, keepdims=True)
        y = (z - mu) * lax.rsqrt(var + eps) * g_ref[...] + bt_ref[...]
        if apply_mask:
            y = y * m_ref[...]
        o_ref[...] = y


def matmul_residual_layernorm(x, w, b, residual, gamma, beta, mask=None,
                              eps=1e-12):
    """LayerNorm(residual + ungroup(x) @ w + b) [* mask].

    x: grouped activation [nK, M, ck] (attention context or FFN hidden),
    w: matching grouped weight [nK, ck, H].  The contraction iterates over the
    group axis, so each MXU pass sees a ck-wide (>=256 at real sizes) K dim.
    """
    nK, M, ck = x.shape
    H = w.shape[-1]
    tm = _row_tile(M)
    nm = M // tm
    apply_mask = mask is not None
    kern = functools.partial(_matmul_res_ln_kernel, nk=nK, eps=eps,
                             apply_mask=apply_mask)
    in_specs = [
        pl.BlockSpec((1, tm, ck), lambda i, k: (k, i, 0)),
        pl.BlockSpec((1, ck, H), lambda i, k: (k, 0, 0)),
        pl.BlockSpec((1, H), lambda i, k: (0, 0)),
        pl.BlockSpec((tm, H), lambda i, k: (i, 0)),   # residual (resident on k)
        pl.BlockSpec((1, H), lambda i, k: (0, 0)),
        pl.BlockSpec((1, H), lambda i, k: (0, 0)),
    ]
    args = [x, w, b.reshape(1, H), residual,
            gamma.reshape(1, H), beta.reshape(1, H)]
    if apply_mask:
        in_specs.append(pl.BlockSpec((tm, 1), lambda i, k: (i, 0)))
        args.append(mask)
    cost = pl.CostEstimate(
        flops=2 * M * nK * ck * H + 8 * M * H,
        transcendentals=M,
        bytes_accessed=2 * M * nK * ck + 2 * nK * ck * H + 9 * M * H)
    return pl.pallas_call(
        kern,
        out_shape=jax.ShapeDtypeStruct((M, H), jnp.float32),
        grid=(nm, nK),
        in_specs=in_specs,
        out_specs=pl.BlockSpec((tm, H), lambda i, k: (i, 0)),
        scratch_shapes=[pltpu.VMEM((tm, H), jnp.float32)],
        compiler_params=pltpu.CompilerParams(
            dimension_semantics=("parallel", "arbitrary"),
            vmem_limit_bytes=_VMEM_LIMIT),
        cost_estimate=cost,
    )(*args)


# ----------------------------------------------------------------------------
# Row-tiled LayerNorm (embeddings only; no residual)
# ----------------------------------------------------------------------------
def _layernorm_kernel(x_ref, g_ref, b_ref, o_ref, *, eps):
    z = x_ref[...]
    mu = jnp.mean(z, axis=-1, keepdims=True)
    var = jnp.mean((z - mu) * (z - mu), axis=-1, keepdims=True)
    o_ref[...] = (z - mu) * lax.rsqrt(var + eps) * g_ref[...] + b_ref[...]


def layernorm(x, gamma, beta, eps=1e-12):
    M, H = x.shape
    tm = _row_tile(M)
    nm = M // tm
    kern = functools.partial(_layernorm_kernel, eps=eps)
    return pl.pallas_call(
        kern,
        out_shape=jax.ShapeDtypeStruct((M, H), jnp.float32),
        grid=(nm,),
        in_specs=[
            pl.BlockSpec((tm, H), lambda i: (i, 0)),
            pl.BlockSpec((1, H), lambda i: (0, 0)),
            pl.BlockSpec((1, H), lambda i: (0, 0)),
        ],
        out_specs=pl.BlockSpec((tm, H), lambda i: (i, 0)),
        compiler_params=pltpu.CompilerParams(
            dimension_semantics=("parallel",),
            vmem_limit_bytes=_VMEM_LIMIT),
    )(x, gamma.reshape(1, H), beta.reshape(1, H))


# ----------------------------------------------------------------------------
# Multi-head attention over head-grouped QKV: grid = (head groups, batch)
# ----------------------------------------------------------------------------
def _attention_kernel(qkv_ref, bias_ref, o_ref, *, heads_per_group, head_dim):
    G, Dh = heads_per_group, head_dim
    bias = bias_ref[0]                                   # (1, S) additive mask
    q_all = qkv_ref[0, :, 0:G * Dh]                      # (S, G*Dh), lane-dense
    k_all = qkv_ref[0, :, G * Dh:2 * G * Dh]
    v_all = qkv_ref[0, :, 2 * G * Dh:3 * G * Dh]
    for g in range(G):                                   # bounded unroll (G<=4)
        q = q_all[:, g * Dh:(g + 1) * Dh]
        k = k_all[:, g * Dh:(g + 1) * Dh]
        v = v_all[:, g * Dh:(g + 1) * Dh]
        # q @ k^T; the 1/sqrt(Dh) scale is folded into the Q weights at pack.
        s = lax.dot_general(q, k, (((1,), (1,)), ((), ())),
                            preferred_element_type=jnp.float32)      # (S, S)
        s = s + bias
        s = s - jnp.max(s, axis=-1, keepdims=True)
        p = jnp.exp(s)
        p = p * (1.0 / jnp.sum(p, axis=-1, keepdims=True))  # exact softmax
        o_ref[0, :, g * Dh:(g + 1) * Dh] = jnp.dot(
            p.astype(jnp.bfloat16), v,
            preferred_element_type=jnp.float32).astype(o_ref.dtype)


def multi_head_attention(qkv, attn_bias, *, seq_len, heads_per_group, head_dim):
    """qkv: [nG, B*S, 3*G*Dh] head-grouped; attn_bias: [B, 1, S] additive.
    Returns the head-grouped context [nG, B*S, G*Dh] (bf16)."""
    nG, M, W3 = qkv.shape
    B = M // seq_len
    G, Dh = heads_per_group, head_dim
    # TODO(synk): for very long S, add flash-style KV tiling; BERT S<=512 fits.
    kern = functools.partial(_attention_kernel, heads_per_group=G, head_dim=Dh)
    cost = pl.CostEstimate(
        flops=4 * B * nG * G * seq_len * seq_len * Dh,
        transcendentals=B * nG * G * seq_len * seq_len,
        bytes_accessed=2 * nG * M * W3 + 2 * nG * M * G * Dh + 4 * B * seq_len)
    return pl.pallas_call(
        kern,
        out_shape=jax.ShapeDtypeStruct((nG, M, G * Dh), jnp.bfloat16),
        grid=(nG, B),
        in_specs=[
            pl.BlockSpec((1, seq_len, W3), lambda g, b: (g, b, 0)),
            pl.BlockSpec((1, 1, seq_len), lambda g, b: (b, 0, 0)),
        ],
        out_specs=pl.BlockSpec((1, seq_len, G * Dh), lambda g, b: (g, b, 0)),
        compiler_params=pltpu.CompilerParams(
            dimension_semantics=("parallel", "parallel"),
            vmem_limit_bytes=_VMEM_LIMIT),
        cost_estimate=cost,
    )(qkv, attn_bias)


# ----------------------------------------------------------------------------
# Parameters: standard-layout init, then one-time packing for the kernels
# ----------------------------------------------------------------------------
def init_params(key, *, vocab, max_pos, hidden, num_heads, ffn, num_layers):
    """Standard-layout BERT-style parameters (stand-ins for SpanBERT weights)."""
    del num_heads  # structure only; head split happens at pack time

    def nrm(k, shape, scale=0.02):
        return scale * jax.random.normal(k, shape, dtype=jnp.float32)

    keys = jax.random.split(key, 2 + num_layers)
    params = {
        "emb_tok": nrm(keys[0], (vocab, hidden)),
        "emb_pos": nrm(keys[1], (max_pos, hidden)),
        "ln_emb_g": jnp.ones((hidden,), jnp.float32),
        "ln_emb_b": jnp.zeros((hidden,), jnp.float32),
        "layers": [],
    }
    for li in range(num_layers):
        lk = jax.random.split(keys[2 + li], 6)
        params["layers"].append({
            "wq": nrm(lk[0], (hidden, hidden)),
            "wk": nrm(lk[1], (hidden, hidden)),
            "wv": nrm(lk[2], (hidden, hidden)),
            "bq": jnp.zeros((hidden,), jnp.float32),
            "bk": jnp.zeros((hidden,), jnp.float32),
            "bv": jnp.zeros((hidden,), jnp.float32),
            "wo": nrm(lk[3], (hidden, hidden)),
            "bo": jnp.zeros((hidden,), jnp.float32),
            "ln1_g": jnp.ones((hidden,), jnp.float32),
            "ln1_b": jnp.zeros((hidden,), jnp.float32),
            "w1": nrm(lk[4], (hidden, ffn)),
            "b1": jnp.zeros((ffn,), jnp.float32),
            "w2": nrm(lk[5], (ffn, hidden)),
            "b2": jnp.zeros((hidden,), jnp.float32),
            "ln2_g": jnp.ones((hidden,), jnp.float32),
            "ln2_b": jnp.zeros((hidden,), jnp.float32),
        })
    return params


def pack_params(params, *, num_heads):
    """One-time weight packing for the kernels:
      * matmul weights cast to bf16 (MXU-native, halves weight DMA),
      * QKV weights/bias regrouped head-major -> [nG, H, 3*G*Dh],
      * 1/sqrt(Dh) folded into the Q projection,
      * wo / w1 / w2 regrouped to match the grouped activation layouts.
    """
    hidden = params["emb_tok"].shape[1]
    head_dim = hidden // num_heads
    G = _heads_per_group(num_heads, head_dim)
    nG = num_heads // G
    gw = G * head_dim
    scale = 1.0 / (head_dim ** 0.5)

    def head_group(w):               # [H, H] -> [nG, H, G*Dh]
        return w.reshape(hidden, nG, gw).transpose(1, 0, 2)

    packed = {
        "emb_tok": params["emb_tok"],
        "emb_pos": params["emb_pos"],
        "ln_emb_g": params["ln_emb_g"],
        "ln_emb_b": params["ln_emb_b"],
        "head_dim": head_dim,
        "heads_per_group": G,
        "layers": [],
    }
    for lyr in params["layers"]:
        ffn = lyr["w1"].shape[1]
        tg = _tile(ffn, (512, 256, 128))
        nJ = ffn // tg
        wqkv = jnp.concatenate(
            [head_group(lyr["wq"] * scale), head_group(lyr["wk"]),
             head_group(lyr["wv"])], axis=-1)             # [nG, H, 3*G*Dh]
        bqkv = jnp.concatenate(
            [(lyr["bq"] * scale).reshape(nG, 1, gw),
             lyr["bk"].reshape(nG, 1, gw),
             lyr["bv"].reshape(nG, 1, gw)], axis=-1)      # [nG, 1, 3*G*Dh]
        w1g = lyr["w1"].reshape(hidden, nJ, tg).transpose(1, 0, 2)  # [nJ,H,tg]
        packed["layers"].append({
            "wqkv": wqkv.astype(jnp.bfloat16),
            "bqkv": bqkv,
            "wo": lyr["wo"].reshape(nG, gw, hidden).astype(jnp.bfloat16),
            "bo": lyr["bo"],
            "ln1_g": lyr["ln1_g"], "ln1_b": lyr["ln1_b"],
            "w1": w1g.astype(jnp.bfloat16),
            "b1": lyr["b1"].reshape(nJ, 1, tg),
            "w2": lyr["w2"].reshape(nJ, tg, hidden).astype(jnp.bfloat16),
            "b2": lyr["b2"],
            "ln2_g": lyr["ln2_g"], "ln2_b": lyr["ln2_b"],
        })
    return packed


# ----------------------------------------------------------------------------
# Forward (glue around the Pallas kernels)
# ----------------------------------------------------------------------------
def encoder_spanbert_forward(packed, text_inputs, mask_input):
    """Mirrors Encoder_SpanBERT.forward: BERT encoder, then out * mask[...,None]."""
    B, S = text_inputs.shape
    H = packed["emb_tok"].shape[1]
    Dh = packed["head_dim"]
    G = packed["heads_per_group"]
    M = B * S

    # Embedding lookup (gather) kept in plain JAX glue.
    # TODO(synk): embedding gather could become a scalar-prefetch DMA kernel.
    emb = packed["emb_tok"][text_inputs] + packed["emb_pos"][:S][None, :, :]
    x = layernorm(emb.reshape(M, H).astype(jnp.float32),
                  packed["ln_emb_g"], packed["ln_emb_b"])

    mask_f = mask_input.astype(jnp.float32)
    attn_bias = ((1.0 - mask_f) * (-1e9)).reshape(B, 1, S)
    mask_col = mask_f.reshape(M, 1)

    layers = packed["layers"]
    for li, lyr in enumerate(layers):
        last = li == len(layers) - 1
        # --- self-attention block: fused head-grouped QKV projection ---
        qkv = matmul_bias_grouped(x, lyr["wqkv"], lyr["bqkv"])   # [nG,M,3*G*Dh]
        ctx = multi_head_attention(qkv, attn_bias, seq_len=S,
                                   heads_per_group=G, head_dim=Dh)  # [nG,M,G*Dh]
        x = matmul_residual_layernorm(ctx, lyr["wo"], lyr["bo"], residual=x,
                                      gamma=lyr["ln1_g"], beta=lyr["ln1_b"])
        # --- feed-forward block (final mask fused into last epilogue) ---
        f = matmul_bias_grouped(x, lyr["w1"], lyr["b1"], activation="gelu")
        x = matmul_residual_layernorm(f, lyr["w2"], lyr["b2"], residual=x,
                                      gamma=lyr["ln2_g"], beta=lyr["ln2_b"],
                                      mask=mask_col if last else None)
    return x.reshape(B, S, H)


# ----------------------------------------------------------------------------
# Demo
# ----------------------------------------------------------------------------
if __name__ == "__main__":
    # Small demo config (real SpanBERT: hidden=768, 12 heads, 12 layers, S=512).
    B, S = 2, 8
    VOCAB, MAX_POS = 50, 16
    HIDDEN, NUM_HEADS, FFN, LAYERS = 32, 2, 64, 2

    root = jax.random.PRNGKey(0)
    k_par, k_tok = jax.random.split(root)

    params = init_params(k_par, vocab=VOCAB, max_pos=MAX_POS, hidden=HIDDEN,
                         num_heads=NUM_HEADS, ffn=FFN, num_layers=LAYERS)
    packed = pack_params(params, num_heads=NUM_HEADS)

    text_inputs = jax.random.randint(k_tok, (B, S), 0, VOCAB, dtype=jnp.int32)
    len_seq = jnp.array([S, 5], dtype=jnp.int32)
    mask_input = (jnp.arange(S)[None, :] < len_seq[:, None]).astype(jnp.float32)

    out = encoder_spanbert_forward(packed, text_inputs, mask_input)
    out = jax.block_until_ready(out)

    assert out.shape == (B, S, HIDDEN)
    assert bool(jnp.all(jnp.isfinite(out)))
    # padded positions must be zeroed by the (fused) final mask multiply
    assert bool(jnp.all(out[1, 5:] == 0.0))
    print("KERNEL_OK")
</pallas_src>

<mosaic_0001>
module attributes {stable_mosaic.version = 11 : i64} {
  func.func @_layernorm_kernel(%arg0: i32, %arg1: memref<8x32xf32, #tpu.memory_space<vmem>>, %arg2: memref<1x32xf32, #tpu.memory_space<vmem>>, %arg3: memref<1x32xf32, #tpu.memory_space<vmem>>, %arg4: memref<8x32xf32, #tpu.memory_space<vmem>>) attributes {dimension_semantics = [#tpu.dimension_semantics<parallel>], iteration_bounds = array<i64: 2>, scalar_prefetch = 0 : i64, scratch_operands = 0 : i64, tpu.core_type = #tpu.core_type<tc>, window_params = [{transform_indices = @transform_0, window_bounds = array<i64: 8, 32>}, {pipeline_mode = #tpu.pipeline_mode<synchronous>, transform_indices = @transform_1, window_bounds = array<i64: 1, 32>}, {pipeline_mode = #tpu.pipeline_mode<synchronous>, transform_indices = @transform_2, window_bounds = array<i64: 1, 32>}, {transform_indices = @transform_3, window_bounds = array<i64: 8, 32>}]} {
    %c0 = arith.constant 0 : index
    %c0_0 = arith.constant 0 : index
    %0 = vector.load %arg1[%c0, %c0_0] : memref<8x32xf32, #tpu.memory_space<vmem>>, vector<8x32xf32>
    %cst = arith.constant dense<0.000000e+00> : vector<8xf32>
    %1 = vector.multi_reduction <add>, %0, %cst [1] : vector<8x32xf32> to vector<8xf32>
    %2 = vector.shape_cast %1 : vector<8xf32> to vector<8x1xf32>
    %cst_1 = arith.constant 3.200000e+01 : f32
    %3 = vector.broadcast %cst_1 : f32 to vector<8x1xf32>
    %4 = arith.divf %2, %3 : vector<8x1xf32>
    %5 = vector.broadcast %4 : vector<8x1xf32> to vector<8x32xf32>
    %6 = arith.subf %0, %5 : vector<8x32xf32>
    %7 = vector.broadcast %4 : vector<8x1xf32> to vector<8x32xf32>
    %8 = arith.subf %0, %7 : vector<8x32xf32>
    %9 = arith.mulf %6, %8 : vector<8x32xf32>
    %cst_2 = arith.constant dense<0.000000e+00> : vector<8xf32>
    %10 = vector.multi_reduction <add>, %9, %cst_2 [1] : vector<8x32xf32> to vector<8xf32>
    %11 = vector.shape_cast %10 : vector<8xf32> to vector<8x1xf32>
    %cst_3 = arith.constant 3.200000e+01 : f32
    %12 = vector.broadcast %cst_3 : f32 to vector<8x1xf32>
    %13 = arith.divf %11, %12 : vector<8x1xf32>
    %14 = vector.broadcast %4 : vector<8x1xf32> to vector<8x32xf32>
    %15 = arith.subf %0, %14 : vector<8x32xf32>
    %cst_4 = arith.constant 9.99999996E-13 : f32
    %16 = vector.broadcast %cst_4 : f32 to vector<8x1xf32>
    %17 = arith.addf %13, %16 : vector<8x1xf32>
    %18 = math.rsqrt %17 : vector<8x1xf32>
    %19 = vector.broadcast %18 : vector<8x1xf32> to vector<8x32xf32>
    %20 = arith.mulf %15, %19 : vector<8x32xf32>
    %c0_5 = arith.constant 0 : index
    %c0_6 = arith.constant 0 : index
    %21 = vector.load %arg2[%c0_5, %c0_6] : memref<1x32xf32, #tpu.memory_space<vmem>>, vector<1x32xf32>
    %22 = vector.broadcast %21 : vector<1x32xf32> to vector<8x32xf32>
    %23 = arith.mulf %20, %22 : vector<8x32xf32>
    %c0_7 = arith.constant 0 : index
    %c0_8 = arith.constant 0 : index
    %24 = vector.load %arg3[%c0_7, %c0_8] : memref<1x32xf32, #tpu.memory_space<vmem>>, vector<1x32xf32>
    %25 = vector.broadcast %24 : vector<1x32xf32> to vector<8x32xf32>
    %26 = arith.addf %23, %25 : vector<8x32xf32>
    %c0_9 = arith.constant 0 : index
    %c0_10 = arith.constant 0 : index
    %27 = vector.load %arg4[%c0_9, %c0_10] : memref<8x32xf32, #tpu.memory_space<vmem>>, vector<8x32xf32>
    tpu.vector_store %arg4[%c0_9, %c0_10], %26 {strides = array<i32>} : memref<8x32xf32, #tpu.memory_space<vmem>>, vector<8x32xf32>,
    return
  }
  func.func @transform_0(%arg0: i32) -> (i32, i32) {
    %c0_i32 = arith.constant 0 : i32
    %c0_i32_0 = arith.constant 0 : i32
    return %arg0, %c0_i32 : i32, i32
  }
  func.func @transform_1(%arg0: i32) -> (i32, i32) {
    %c0_i32 = arith.constant 0 : i32
    %c0_i32_0 = arith.constant 0 : i32
    %c0_i32_1 = arith.constant 0 : i32
    return %c0_i32, %c0_i32_0 : i32, i32
  }
  func.func @transform_2(%arg0: i32) -> (i32, i32) {
    %c0_i32 = arith.constant 0 : i32
    %c0_i32_0 = arith.constant 0 : i32
    %c0_i32_1 = arith.constant 0 : i32
    return %c0_i32, %c0_i32_0 : i32, i32
  }
  func.func @transform_3(%arg0: i32) -> (i32, i32) {
    %c0_i32 = arith.constant 0 : i32
    %c0_i32_0 = arith.constant 0 : i32
    return %arg0, %c0_i32 : i32, i32
  }
}

</mosaic_0001>

<bundles_post_ra>
// kernel: tpu_custom_call.1
= control target key start
LH: loop header
LB: loop body
LE: loop exit
PB: predicated region body
PF: predicated region fallthrough
CT: control target
= control target key end

     0   :  { %8 = vsyncpa [#allocation3], 0  ;;  %s655_s0 = inlined_call_operand.hbm [shape: f32[16,32], index: 0, kind: input, shape index: {}]   ;;  %s656_s1 = inlined_call_operand.vmem [shape: f32[1,32], index: 1, kind: input, shape index: {}]   ;;  %s657_s2 = inlined_call_operand.vmem [shape: f32[1,32], index: 2, kind: input, shape index: {}]   ;;  %s658_s3 = inlined_call_operand.hbm [shape: f32[16,32], index: 3, kind: output, shape index: {}]  }
   0x1   :  { %10 = vsyncpa [#allocation3 + $0x1], 0 }
   0x2   :  { %11 = vsyncpa [#allocation4], 0 }
   0x3   :  { %13 = vsyncpa [#allocation4 + $0x1], 0  ;;  %s485_s12 = smov 0   ;;  %s487_s13 = smov 0  }
   0x4   :  { %s489_s14 = smov 0   ;;  %s491_s15 = smov 0  }
   0x5 LB: > { %s506_s16 = sadd.s32 4294967295, %s461_s15   ;;  %s303_s17 = sadd.s32 4294967294, %s461_s15   ;;  %s461_s15 = sphi %s491_s15, %s673_s15   ;;  %s457_s14 = sphi %s489_s14, %s672_s14   ;;  %s453_s13 = sphi %s487_s13, %s671_s13   ;;  %s449_s12 = sphi %s485_s12, %s670_s12  }
   0x6   : > { %s510_s18 = sadd.s32 1, %s461_s15   ;;  %s26_s19 = sadd.s32 1, %s457_s14 }
   0x7   : > { %s23_s20 = ssub.s32 %s461_s15, %s510_s18  ;;  %p33_p0 = scmp.ne.s32.totalorder %s457_s14, %s453_s13 }
   0x8   : > { %p24_p1 = scmp.eq.s32.totalorder %s23_s20, 0  ;;  %p34_p2 = scmp.eq.s32.totalorder %s461_s15, 0 }
   0x9   : > { %p39_p3 = scmp.ne.s32.totalorder %s453_s13, %s449_s12  ;;  %p40_p4 = scmp.eq.s32.totalorder %s506_s16, 0 }
   0xa   : > { %s522_s21 = scalar_select %p24_p1, %s457_s14, %s26_s19  }
   0xb   : > { %p524_p5 = por %p34_p2, %p33_p0  ;;  %p528_p6 = por %p40_p4, %p39_p3 }
   0xc   : > { %p105_p7 = scmp.eq.s32.totalorder %s506_s16, 1  ;;  %p111_p8 = scmp.eq.s32.totalorder %s303_s17, 1 }
   0xd   : > { %p329_p10 = scmp.lt.s32.totalorder %s461_s15, 2  ;;  %s137_s26 = sand.u32 1, %s457_s14  }
   0xe   : > { %p535_p11 = por %p105_p7, %p33_p0  ;;  %p539_p12 = por %p111_p8, %p39_p3 }
   0xf   : > { %s307_s27 = sshll.u32 %s461_s15, 7  ;;  %s306_s28 = sshll.u32 %s137_s26, 3 }
  0x10   : > { %s662_s24 = scalar_select %p535_p11, 1, 0 }
  0x11   : > { %s663_s25 = scalar_select %p539_p12, 1, 0 }
  0x12   : > { %s548_s4 = scalar_lea.hbm %s655_s0, %s307_s27  ;;  %s141_s5 = scalar_lea.vmem [#allocation2], %s306_s28 }
  0x13   : > { %s148_s6 = sshll.u32 %s141_s5, 4  ;;  %p552_p13 = pnand %p329_p10, %p524_p5  ;;  %s556_s6 = int_to_ptr.vmem [resolvable:$true] %s148_s6 }
  0x14   : > { %s138_s8 = scalar_lea.sflag [#allocation3], %s137_s26  ;;  %s365_s9 = scalar_lea.hbm %s548_s4, 128 }
  0x15   : > { %p366_p2 = scmp.ne.s32.totalorder %s548_s4, %s365_s9  ;;  %p367_p3 = pneg %p552_p13 }
  0x16   : > { %s370_s17 = scalar_lea.hbm %s655_s0, 256  ;;  %p371_p5 = scmp.lt.u32.totalorder %s548_s4, %s655_s0 }
  0x17   : > { %p368_p4 = pnand %p367_p3, %p366_p2  ;;  %p372_p8 = scmp.lt.u32.totalorder %s370_s17, %s365_s9 }
  0x18   : > { %p374_p9 = scmp.lt.u32.totalorder %s365_s9, %s548_s4 }
  0x19   : > { %p369_p7 = pneg %p368_p4  ;;  %p373_p10 = por %p372_p8, %p371_p5 }
  0x1b   : > { %p375_p0 = por %p374_p9, %p373_p10 }
  0x1d   : > { %p376_p1 = pnand %p375_p0, %p369_p7 }
  0x1f   : > { %379 = shalt.err (!%p376_p1)
}
  0x20   : > { %s380_s22 = scalar_lea.vmem %s556_s6, 128  ;;  %s463_s26 = smov [#allocation2]  }
  0x21   : > { %p381_p2 = scmp.ne.s32.totalorder %s556_s6, %s380_s22  ;;  %s385_s27 = sshll.u32 %s463_s26, 4  ;;  %s386_s27 = int_to_ptr.vmem [resolvable:$false] %s385_s27 }
  0x22   : > { %s387_s28 = scalar_lea.vmem %s386_s27, 256  ;;  %p388_p11 = scmp.lt.s32.totalorder %s556_s6, %s386_s27 }
  0x23   : > { %p383_p4 = pnand %p381_p2, %p367_p3  ;;  %p389_p5 = scmp.lt.s32.totalorder %s387_s28, %s380_s22 }
  0x25   : > { %p384_p12 = pneg %p383_p4  ;;  %p390_p8 = por %p389_p5, %p388_p11 }
  0x27   : > { %p391_p9 = pnand %p390_p8, %p384_p12 }
  0x29   : > { %394 = shalt.err (!%p391_p9)
}
  0x2a   : > { %324 = dma.hbm_to_vmem [thread:$0]  (!%p552_p13), %s548_s4, 128, %s556_s6, %s138_s8  }
  0x2b   : > { %p665_p0 = scmp.lt.s32.totalorder %s461_s15, 3  ;;  %p666_p1 = scmp.ge.s32.totalorder %s461_s15, 1 }
  0x2d   : > { %p154_p3 = pnand %p666_p1, %p665_p0 }
  0x2e   : > { %s590_s29 = sand.u32 (!%p154_p3), 1, %s453_s13  }
  0x2f   : > { %157 = sbr.rel (%p154_p3) target bundleno = 383 (0x17f), region = 32  ;;  %s309_s30 = sshll.u32 (!%p154_p3), %s590_s29, 3 }
  0x30   : > { %s160_s5 = scalar_lea.sflag (!%p154_p3), [#allocation3], %s590_s29  ;;  %s163_s9 = scalar_lea.vmem (!%p154_p3), [#allocation2], %s309_s30 }
  0x36   : > { %440 = dma.done.wait (%p528_p6), %s160_s5, 128  }
  0x37   : > { %442 = vsyncadd (%p528_p6), %s160_s5, 4294967168  ;;  %vm187_vm0 = vcmask 261120   ;;  %v186_v0 = vld [vmem:[%s163_s9] sm:$0xff]  ;;  %s314_s8 = sshll.u32 %s506_s16, 7  ;;  %s185_s10 = scalar_lea.vmem [#allocation5], %s309_s30 }
  0x38   : > { %v188_v1 = vsel %vm187_vm0, %v186_v0, 0.0  ;;  %v311_v11 = vld [vmem:[%s656_s1] ss:$0 sm:$0xff]  ;;  %s233_s11 = sshll.u32 %s185_s10, 4  ;;  %s610_s20 = scalar_lea.hbm %s658_s3, %s314_s8  ;;  %s612_s11 = int_to_ptr.vmem [resolvable:$true] %s233_s11 }
  0x39   : > { %189 = vadd.xlane.f32.xlu0 %v188_v1  ;;  %v312_v13 = vld [vmem:[%s657_s2] ss:$0 sm:$0xff]  ;;  %s220_s22 = scalar_lea.sflag [#allocation4], %s590_s29  ;;  %s395_s26 = scalar_lea.vmem %s612_s11, 128 }
  0x3a   : > { %p396_p6 = scmp.ne.s32.totalorder %s612_s11, %s395_s26  ;;  %p667_p11 = scmp.ne.s32.totalorder %s662_s24, 0 }
  0x3b   : > { %s464_s16 = smov [#allocation5]  }
  0x3c   : > { %p397_p12 = pnand %p396_p6, %p667_p11  ;;  %s399_s27 = sshll.u32 %s464_s16, 4  ;;  %s400_s27 = int_to_ptr.vmem [resolvable:$false] %s399_s27 }
  0x3d   : > { %s401_s28 = scalar_lea.vmem %s400_s27, 256  ;;  %p402_p7 = scmp.lt.s32.totalorder %s612_s11, %s400_s27 }
  0x3e   : > { %p398_p13 = pneg %p397_p12  ;;  %p403_p10 = scmp.lt.s32.totalorder %s401_s28, %s395_s26 }
  0x40   : > { %p404_p2 = por %p403_p10, %p402_p7 }
  0x42   : > { %p405_p4 = pnand %p404_p2, %p398_p13 }
  0xc6   : > { %v190_v2 = vpop.xlane.xlu0 %189 }
  0xc7   : > { %v192_v3 = vmul.f32 0.03125, %v190_v2 }
  0xc9   : > { %v193_v4 = vsub.f32 %v186_v0, %v192_v3 }
  0xcb   : > { %v194_v5 = vmul.f32 %v193_v4, %v193_v4 }
  0xcd   : > { %v195_v6 = vsel %vm187_vm0, %v194_v5, 0.0 }
  0xce   : > { %196 = vadd.xlane.f32.xlu0 %v195_v6 }
 0x15b   : > { %v197_v7 = vpop.xlane.xlu0 %196 }
 0x15c   : > { %v198_v8 = vmul.f32 0.03125, %v197_v7 }
 0x15e   : > { %v199_v9 = vadd.f32 1e-12, %v198_v8 }
 0x160   : > { %363 = vrsqrt.f32 %v199_v9 }
 0x16a   : > { %v364_v10 = vpop.eup %363 }
 0x16b   : > { %v201_v12 = vmul.f32 %v364_v10, %v193_v4 }
 0x16d   : > { %v209_v14 = vmul.f32 %v311_v11, %v201_v12 }
 0x16f   : > { %v217_v15 = vadd.f32 %v312_v13, %v209_v14 }
 0x171   : > { %218 = vst.msk [vmem:[%s185_s10] sm:$0xff] %vm187_vm0, %v217_v15 }
 0x172   : > { %408 = shalt.err (!%p405_p4)
}
 0x173   : > { %s409_s29 = scalar_lea.hbm %s610_s20, 128  ;;  %s413_s9 = scalar_lea.hbm %s658_s3, 256 }
 0x174   : > { %p410_p5 = scmp.ne.s32.totalorder %s610_s20, %s409_s29  ;;  %p414_p0 = scmp.lt.u32.totalorder %s610_s20, %s658_s3 }
 0x175   : > { %p415_p1 = scmp.lt.u32.totalorder %s413_s9, %s409_s29  ;;  %p417_p6 = scmp.lt.u32.totalorder %s409_s29, %s610_s20 }
 0x176   : > { %p411_p8 = pnand %p410_p5, %p667_p11 }
 0x177   : > { %p416_p3 = por %p415_p1, %p414_p0 }
 0x178   : > { %p412_p9 = pneg %p411_p8 }
 0x179   : > { %p418_p12 = por %p417_p6, %p416_p3 }
 0x17b   : > { %p419_p13 = pnand %p418_p12, %p412_p9 }
 0x17d   : > { %422 = shalt.err (!%p419_p13)
}
 0x17e   : > { %319 = dma.vmem_to_hbm [thread:$0]  (%p667_p11), %s612_s11, 128, %s610_s20, %s220_s22  }
 0x17f PF: > { %s245_s6 = sand.u32 1, %s449_s12   ;;  %p668_p7 = scmp.ne.s32.totalorder %s663_s25, 0 }
 0x180   : > { %p669_p10 = scmp.ge.s32.totalorder %s461_s15, 2  ;;  %s246_s7 = scalar_lea.sflag [#allocation4], %s245_s6 }
 0x182   : > { %p326_p2 = pnand %p669_p10, %p668_p7 }
 0x184   : > { %444 = dma.done.wait (!%p326_p2), %s246_s7, 128  }
 0x185   : > { %446 = vsyncadd (!%p326_p2), %s246_s7, 4294967168  ;;  %p16_p4 = scmp.ge.s32.totalorder %s510_s18, 4   ;;  %s670_s12 = smov %s453_s13 }
 0x186   : > { %s671_s13 = smov %s457_s14  ;;  %s672_s14 = smov %s522_s21 }
 0x187   : > { %s673_s15 = smov %s510_s18  ;;  %18 = sbr.rel (!%p16_p4) target bundleno = 5 (0x5), region = 77 }
 0x18e   :  { %251 = vsyncpa [#allocation3], 1 }
 0x18f   :  { %253 = vsyncpa [#allocation3 + $0x1], 1 }
 0x190   :  { %254 = vsyncpa [#allocation4], 1 }
 0x191   :  { %256 = vsyncpa [#allocation4 + $0x1], 1 }

</bundles_post_ra>
